<compile_context>
chip_gen: v7x
topology: tpu7x:2x2x1
jax: 0.10.0
libtpu: 0.0.40
codegen_flags: <defaults>
</compile_context>

<pallas_src>
import jax
import jax.numpy as jnp
from jax.experimental import pallas as pl
from jax.experimental.pallas import tpu as pltpu

# Logical (PyTorch) dimensions.
D_IN, D_HID, D_OUT = 3, 2, 20
# Padded (TPU-friendly) dimensions: contraction dims stay tiny (8), only the
# output lane dimension is padded to a full 128-lane vreg width.
PB, P_IN, P_HID, P_OUT = 8, 8, 8, 128


def _mlp_kernel(x_ref, w1_ref, w2_ref, b_ref, o_ref):
    # fc1: x @ W1 + b1, then ReLU.  x:(8,8) @ w1:(8,8) -> h:(8,8)
    h = jnp.dot(x_ref[...], w1_ref[...], preferred_element_type=jnp.float32)
    h = h + b_ref[0:1, :P_HID]          # b1 lives in row 0 of the bias pack
    h = jnp.maximum(h, 0.0)
    # fc2: h @ W2 + b2.  h:(8,8) @ w2:(8,128) -> o:(8,128)  (lane-dense store)
    o = jnp.dot(h, w2_ref[...], preferred_element_type=jnp.float32)
    o_ref[...] = o + b_ref[1:2, :]      # b2 lives in row 1 of the bias pack


def pad_params(w1, b1, w2, b2):
    """One-time conversion of PyTorch-layout params (w: [out,in], b: [out])
    to the padded [in, out] canonical layout consumed by the kernel."""
    w1p = (jnp.zeros((P_IN, P_HID), jnp.float32)
           .at[:D_IN, :D_HID].set(w1.T.astype(jnp.float32)))
    w2p = (jnp.zeros((P_HID, P_OUT), jnp.float32)
           .at[:D_HID, :D_OUT].set(w2.T.astype(jnp.float32)))
    bp = jnp.zeros((2, P_OUT), jnp.float32)
    bp = bp.at[0, :D_HID].set(b1.astype(jnp.float32))
    bp = bp.at[1, :D_OUT].set(b2.astype(jnp.float32))
    return w1p, w2p, bp


def toynet_forward(x, w1p, w2p, bp):
    """x: [B, 3] float32 (B <= 8); params in padded canonical layout."""
    B = x.shape[0]
    assert B <= PB, "this single-tile kernel handles B <= 8; grid over batch for more"

    # Only per-call prep: pad x into one (8, 8) tile (256 bytes).
    xp = jnp.zeros((PB, P_IN), jnp.float32).at[:B, :D_IN].set(x.astype(jnp.float32))

    vmem = pl.BlockSpec(memory_space=pltpu.MemorySpace.VMEM)
    out_padded = pl.pallas_call(
        _mlp_kernel,
        out_shape=jax.ShapeDtypeStruct((PB, P_OUT), jnp.float32),
        in_specs=[vmem, vmem, vmem, vmem],
        out_specs=vmem,
    )(xp, w1p, w2p, bp)

    # Padding rows/lanes are mathematically inert and sliced off here.
    return out_padded[:B, :D_OUT]


def init_params(key):
    """Deterministic init mimicking nn.Linear default (uniform(+/- 1/sqrt(fan_in)))."""
    k1, k2, k3, k4 = jax.random.split(key, 4)
    bound1 = 1.0 / jnp.sqrt(jnp.float32(D_IN))
    bound2 = 1.0 / jnp.sqrt(jnp.float32(D_HID))
    w1 = jax.random.uniform(k1, (D_HID, D_IN), jnp.float32, -bound1, bound1)
    b1 = jax.random.uniform(k2, (D_HID,), jnp.float32, -bound1, bound1)
    w2 = jax.random.uniform(k3, (D_OUT, D_HID), jnp.float32, -bound2, bound2)
    b2 = jax.random.uniform(k4, (D_OUT,), jnp.float32, -bound2, bound2)
    return w1, b1, w2, b2


if __name__ == "__main__":
    key = jax.random.PRNGKey(0)
    kx, kp = jax.random.split(key)

    B = 2
    x = jax.random.normal(kx, (B, D_IN), jnp.float32)
    w1, b1, w2, b2 = init_params(kp)

    # One-time parameter preprocessing (hoisted out of the forward pass).
    w1p, w2p, bp = pad_params(w1, b1, w2, b2)

    fwd = jax.jit(toynet_forward)
    out = fwd(x, w1p, w2p, bp)
    out = jax.block_until_ready(out)

    # Pure-JAX reference of the same math (PyTorch layout).
    ref = jnp.maximum(x @ w1.T + b1, 0.0) @ w2.T + b2
    assert out.shape == (B, D_OUT)
    assert jnp.allclose(out, ref, atol=1e-5, rtol=1e-5)

    print("KERNEL_OK")
</pallas_src>

<mosaic_0001>
module attributes {stable_mosaic.version = 11 : i64} {
  func.func @_mlp_kernel(%arg0: memref<8x8xf32, #tpu.memory_space<vmem>>, %arg1: memref<8x8xf32, #tpu.memory_space<vmem>>, %arg2: memref<8x128xf32, #tpu.memory_space<vmem>>, %arg3: memref<2x128xf32, #tpu.memory_space<vmem>>, %arg4: memref<8x128xf32, #tpu.memory_space<vmem>>) attributes {dimension_semantics = [], scalar_prefetch = 0 : i64, scratch_operands = 0 : i64, tpu.core_type = #tpu.core_type<tc>} {
    %c0 = arith.constant 0 : index
    %c0_0 = arith.constant 0 : index
    %0 = vector.load %arg0[%c0, %c0_0] : memref<8x8xf32, #tpu.memory_space<vmem>>, vector<8x8xf32>
    %c0_1 = arith.constant 0 : index
    %c0_2 = arith.constant 0 : index
    %1 = vector.load %arg1[%c0_1, %c0_2] : memref<8x8xf32, #tpu.memory_space<vmem>>, vector<8x8xf32>
    %cst = arith.constant dense<0.000000e+00> : vector<8x8xf32>
    %2 = tpu.matmul %0, %1, %cst {dimension_numbers = #tpu.dot_dimension_numbers<[1], [0], [0], [1], [0, 0, 1, 1], [], []>} : vector<8x8xf32>, vector<8x8xf32>, vector<8x8xf32> -> vector<8x8xf32>
    %c0_3 = arith.constant 0 : index
    %c0_4 = arith.constant 0 : index
    %3 = vector.load %arg3[%c0_3, %c0_4] : memref<2x128xf32, #tpu.memory_space<vmem>>, vector<1x8xf32>
    %4 = vector.broadcast %3 : vector<1x8xf32> to vector<8x8xf32>
    %5 = arith.addf %2, %4 : vector<8x8xf32>
    %cst_5 = arith.constant 0.000000e+00 : f32
    %6 = vector.broadcast %cst_5 : f32 to vector<8x8xf32>
    %7 = arith.maximumf %5, %6 : vector<8x8xf32>
    %c0_6 = arith.constant 0 : index
    %c0_7 = arith.constant 0 : index
    %8 = vector.load %arg2[%c0_6, %c0_7] : memref<8x128xf32, #tpu.memory_space<vmem>>, vector<8x128xf32>
    %cst_8 = arith.constant dense<0.000000e+00> : vector<8x128xf32>
    %9 = tpu.matmul %7, %8, %cst_8 {dimension_numbers = #tpu.dot_dimension_numbers<[1], [0], [0], [1], [0, 0, 1, 1], [], []>} : vector<8x8xf32>, vector<8x128xf32>, vector<8x128xf32> -> vector<8x128xf32>
    %c1 = arith.constant 1 : index
    %c0_9 = arith.constant 0 : index
    %10 = vector.load %arg3[%c1, %c0_9] : memref<2x128xf32, #tpu.memory_space<vmem>>, vector<1x128xf32>
    %11 = vector.broadcast %10 : vector<1x128xf32> to vector<8x128xf32>
    %12 = arith.addf %9, %11 : vector<8x128xf32>
    %c0_10 = arith.constant 0 : index
    %c0_11 = arith.constant 0 : index
    %13 = vector.load %arg4[%c0_10, %c0_11] : memref<8x128xf32, #tpu.memory_space<vmem>>, vector<8x128xf32>
    tpu.vector_store %arg4[%c0_10, %c0_11], %12 {strides = array<i32>} : memref<8x128xf32, #tpu.memory_space<vmem>>, vector<8x128xf32>,
    return
  }
}

</mosaic_0001>

<bundles_post_ra>
// kernel: toynet_forward.1
= control target key start
LH: loop header
LB: loop body
LE: loop exit
PB: predicated region body
PF: predicated region fallthrough
CT: control target
= control target key end

     0   :  { %vm24_vm0 = vcmask 64512   ;;  %v203_v0 = vmov 0.0   ;;  %vm204_vm1 = vmmov 0   ;;  %s250_s1 = inlined_call_operand.vmem [shape: f32[8,8], index: 1, kind: input, shape index: {}]   ;;  %s251_s0 = inlined_call_operand.vmem [shape: f32[8,8], index: 0, kind: input, shape index: {}]   ;;  %s252_s2 = inlined_call_operand.vmem [shape: f32[8,128], index: 2, kind: input, shape index: {}]   ;;  %s253_s3 = inlined_call_operand.vmem [shape: f32[2,128], index: 3, kind: input, shape index: {}]   ;;  %s254_s4 = inlined_call_operand.vmem [shape: f32[8,128], index: 4, kind: output, shape index: {}]  }
   0x1   :  { %191 = vmatprep.subr.mxu0 %v203_v0  ;;  %v18_v1 = vld [vmem:[%s250_s1] sm:$0xff]  ;;  %193 = vmatprep.mubr.msk.f32.mxu0 %vm204_vm1, %v203_v0 }
   0x2   :  { %v17_v2 = vld [vmem:[%s251_s0] sm:$0xff]  ;;  %192 = vmatpush3.msra.mxu0 %v18_v1  ;;  %196 = vmatprep.subr.mxu1 %v203_v0 }
   0x3   :  { %194 = vmatmul.mubr.msk.f32.vlgmr.msra.gmra.mrb[0].mxu0 %vm24_vm0, %v17_v2  ;;  %198 = vmatprep.mubr.msk.f32.mxu1 %vm204_vm1, %v203_v0  ;;  %v99_v3 = vld [vmem:[%s252_s2] sm:$0xff] }
   0x4   :  { %197 = vmatpush3.msra.mxu1 %v99_v3  ;;  %v183_v4 = vld [vmem:[%s253_s3] ss:$0 sm:$0xff]  ;;  %v185_v9 = vld [vmem:[%s253_s3 + $0x1] ss:$0 sm:$0xff] }
  0xd6   :  { %v94_v5 = vpop.f32.mrb[0].mxu0 }
  0xd7   :  { %v95_v6 = vadd.f32 %v183_v4, %v94_v5  ;;  %v195_v7 = vpop.f32.mrb[1].mxu0 }
  0xd9   :  { %v98_v8 = vmax.f32 %v95_v6, 0.0 }
  0xdb   :  { %199 = vmatmul.mubr.msk.f32.vlgmr.msra.gmra.mrb[0].mxu1 %vm24_vm0, %v98_v8 }
 0x1ae   :  { %v174_v10 = vpop.f32.mrb[0].mxu1 }
 0x1af   :  { %v175_v11 = vadd.f32 %v185_v9, %v174_v10  ;;  %v200_v12 = vpop.f32.mrb[1].mxu1 }
 0x1b1   :  { %178 = vst [vmem:[%s254_s4] sm:$0xff] %v175_v11 }

</bundles_post_ra>
